<compile_context>
chip_gen: v5e
topology: v5e:2x2
jax: 0.10.0
libtpu: 0.0.40
codegen_flags: <defaults>
</compile_context>

<pallas_src>
import jax
import jax.numpy as jnp
from jax import lax
from jax.experimental import pallas as pl
from jax.experimental.pallas import tpu as pltpu


def clip_head_kernel(i_f_ref, t_f_ref, w_i_ref, w_t_ref, logits_ref):
    # I_e tile = I_f_tile @ W_i : (tm, D_img) @ (D_img, D_txt) -> (tm, D_txt), f32 accumulate.
    i_e = jnp.dot(i_f_ref[...], w_i_ref[...], preferred_element_type=jnp.float32)
    # T_e tile = T_f_tile @ W_t : (tn, 768) @ (768, D_txt) -> (tn, D_txt), f32 accumulate.
    t_e = jnp.dot(t_f_ref[...], w_t_ref[...], preferred_element_type=jnp.float32)
    # logits tile = I_e @ T_e.T, expressed as a contraction over dim 1 of both
    # operands so no transposed (D_txt, tn) tile is ever materialized.
    logits_ref[...] = lax.dot_general(
        i_e.astype(jnp.bfloat16),
        t_e.astype(jnp.bfloat16),
        dimension_numbers=(((1,), (1,)), ((), ())),
        preferred_element_type=jnp.float32,
    )


def clip_forward(i_f, t_f, w_i, w_t, *, tile_m=None, tile_n=None):
    """Fused CLIP projection + contrastive-logit kernel.

    i_f: (B, D_img)    image-encoder features
    t_f: (B, 768)      text-encoder CLS features
    w_i: (D_img, D_txt)
    w_t: (768, D_txt)
    returns logits: (B, B) float32
    """
    B, d_img = i_f.shape
    d_bert = t_f.shape[1]
    d_txt = w_i.shape[1]

    # bf16 inputs: half the HBM->VMEM traffic, native MXU rate; f32 accumulate in-kernel.
    i_f = i_f.astype(jnp.bfloat16)
    t_f = t_f.astype(jnp.bfloat16)
    w_i = w_i.astype(jnp.bfloat16)
    w_t = w_t.astype(jnp.bfloat16)

    # Tile the (B, B) logits output. 128-wide tiles match v5e's 4x128^2 MXU and
    # keep VMEM tiny; for very large B on v6e/v7x, bump tile_m/tile_n to 256.
    tm = tile_m if tile_m is not None else min(B, 128)
    tn = tile_n if tile_n is not None else min(B, 128)
    assert B % tm == 0 and B % tn == 0, "batch must be divisible by the logits tile"
    grid = (B // tm, B // tn)

    return pl.pallas_call(
        clip_head_kernel,
        out_shape=jax.ShapeDtypeStruct((B, B), jnp.float32),
        grid=grid,
        in_specs=[
            pl.BlockSpec((tm, d_img), lambda i, j: (i, 0)),   # I_f rows for this logits row-tile
            pl.BlockSpec((tn, d_bert), lambda i, j: (j, 0)),  # T_f rows for this logits col-tile
            pl.BlockSpec((d_img, d_txt), lambda i, j: (0, 0)),  # W_i fully resident
            pl.BlockSpec((d_bert, d_txt), lambda i, j: (0, 0)), # W_t fully resident
        ],
        out_specs=pl.BlockSpec((tm, tn), lambda i, j: (i, j)),
        compiler_params=pltpu.CompilerParams(
            dimension_semantics=("parallel", "parallel"),
        ),
    )(i_f, t_f, w_i, w_t)


if __name__ == "__main__":
    # Small shapes consistent with the module's forward:
    #   batch B = 8, image_output_dim = 128, text hidden = 768 (BERT), text_output_dim = 128
    B, D_IMG, D_BERT, D_TXT = 8, 128, 768, 128

    key = jax.random.PRNGKey(0)
    k_if, k_tf, k_wi, k_wt = jax.random.split(key, 4)

    # Deterministic synthetic encoder features (stand-ins for ViT / BERT outputs).
    i_f = jax.random.normal(k_if, (B, D_IMG), dtype=jnp.float32)
    t_f = jax.random.normal(k_tf, (B, D_BERT), dtype=jnp.float32)

    # Parameters, as in __init__: W_i ~ N(0, 0.2^2), W_t ~ N(0, 0.2^2).
    w_i = 0.2 * jax.random.normal(k_wi, (D_IMG, D_TXT), dtype=jnp.float32)
    w_t = 0.2 * jax.random.normal(k_wt, (D_BERT, D_TXT), dtype=jnp.float32)

    logits = clip_forward(i_f, t_f, w_i, w_t)
    logits = jax.block_until_ready(logits)

    # Pure-JAX reference using the same bf16-input / f32-accumulate recipe.
    i_f_b, t_f_b = i_f.astype(jnp.bfloat16), t_f.astype(jnp.bfloat16)
    w_i_b, w_t_b = w_i.astype(jnp.bfloat16), w_t.astype(jnp.bfloat16)
    i_e_ref = jnp.dot(i_f_b, w_i_b, preferred_element_type=jnp.float32)
    t_e_ref = jnp.dot(t_f_b, w_t_b, preferred_element_type=jnp.float32)
    ref = lax.dot_general(
        i_e_ref.astype(jnp.bfloat16), t_e_ref.astype(jnp.bfloat16),
        dimension_numbers=(((1,), (1,)), ((), ())),
        preferred_element_type=jnp.float32,
    )

    assert logits.shape == (B, B)
    assert jnp.allclose(logits, ref, rtol=1e-2, atol=1e-1), (
        float(jnp.max(jnp.abs(logits - ref))))

    print("KERNEL_OK")
</pallas_src>

<mosaic_0001>
module attributes {stable_mosaic.version = 11 : i64} {
  func.func @clip_head_kernel(%arg0: i32, %arg1: i32, %arg2: memref<8x128xbf16, #tpu.memory_space<vmem>>, %arg3: memref<8x768xbf16, #tpu.memory_space<vmem>>, %arg4: memref<128x128xbf16, #tpu.memory_space<vmem>>, %arg5: memref<768x128xbf16, #tpu.memory_space<vmem>>, %arg6: memref<8x8xf32, #tpu.memory_space<vmem>>) attributes {dimension_semantics = [#tpu.dimension_semantics<parallel>, #tpu.dimension_semantics<parallel>], iteration_bounds = array<i64: 1, 1>, scalar_prefetch = 0 : i64, scratch_operands = 0 : i64, tpu.core_type = #tpu.core_type<tc>, window_params = [{transform_indices = @transform_0, window_bounds = array<i64: 8, 128>}, {transform_indices = @transform_1, window_bounds = array<i64: 8, 768>}, {pipeline_mode = #tpu.pipeline_mode<synchronous>, transform_indices = @transform_2, window_bounds = array<i64: 128, 128>}, {pipeline_mode = #tpu.pipeline_mode<synchronous>, transform_indices = @transform_3, window_bounds = array<i64: 768, 128>}, {transform_indices = @transform_4, window_bounds = array<i64: 8, 8>}]} {
    %c0 = arith.constant 0 : index
    %c0_0 = arith.constant 0 : index
    %0 = vector.load %arg2[%c0, %c0_0] : memref<8x128xbf16, #tpu.memory_space<vmem>>, vector<8x128xbf16>
    %c0_1 = arith.constant 0 : index
    %c0_2 = arith.constant 0 : index
    %1 = vector.load %arg4[%c0_1, %c0_2] : memref<128x128xbf16, #tpu.memory_space<vmem>>, vector<128x128xbf16>
    %cst = arith.constant dense<0.000000e+00> : vector<8x128xf32>
    %2 = tpu.matmul %0, %1, %cst {dimension_numbers = #tpu.dot_dimension_numbers<[1], [0], [0], [1], [0, 0, 1, 1], [], []>} : vector<8x128xbf16>, vector<128x128xbf16>, vector<8x128xf32> -> vector<8x128xf32>
    %c0_3 = arith.constant 0 : index
    %c0_4 = arith.constant 0 : index
    %3 = vector.load %arg3[%c0_3, %c0_4] : memref<8x768xbf16, #tpu.memory_space<vmem>>, vector<8x768xbf16>
    %c0_5 = arith.constant 0 : index
    %c0_6 = arith.constant 0 : index
    %4 = vector.load %arg5[%c0_5, %c0_6] : memref<768x128xbf16, #tpu.memory_space<vmem>>, vector<768x128xbf16>
    %cst_7 = arith.constant dense<0.000000e+00> : vector<8x128xf32>
    %5 = tpu.matmul %3, %4, %cst_7 {dimension_numbers = #tpu.dot_dimension_numbers<[1], [0], [0], [1], [0, 0, 1, 1], [], []>} : vector<8x768xbf16>, vector<768x128xbf16>, vector<8x128xf32> -> vector<8x128xf32>
    %6 = arith.truncf %2 : vector<8x128xf32> to vector<8x128xbf16>
    %7 = arith.truncf %5 : vector<8x128xf32> to vector<8x128xbf16>
    %cst_8 = arith.constant dense<0.000000e+00> : vector<8x8xf32>
    %8 = tpu.matmul %6, %7, %cst_8 {dimension_numbers = #tpu.dot_dimension_numbers<[1], [1], [0], [0], [0, 0, 1, 0], [], []>} : vector<8x128xbf16>, vector<8x128xbf16>, vector<8x8xf32> -> vector<8x8xf32>
    %c0_9 = arith.constant 0 : index
    %c0_10 = arith.constant 0 : index
    %9 = vector.load %arg6[%c0_9, %c0_10] : memref<8x8xf32, #tpu.memory_space<vmem>>, vector<8x8xf32>
    tpu.vector_store %arg6[%c0_9, %c0_10], %8 {strides = array<i32>} : memref<8x8xf32, #tpu.memory_space<vmem>>, vector<8x8xf32>,
    return
  }
  func.func @transform_0(%arg0: i32, %arg1: i32) -> (i32, i32) {
    %c0_i32 = arith.constant 0 : i32
    %c0_i32_0 = arith.constant 0 : i32
    return %arg0, %c0_i32 : i32, i32
  }
  func.func @transform_1(%arg0: i32, %arg1: i32) -> (i32, i32) {
    %c0_i32 = arith.constant 0 : i32
    %c0_i32_0 = arith.constant 0 : i32
    return %arg1, %c0_i32 : i32, i32
  }
  func.func @transform_2(%arg0: i32, %arg1: i32) -> (i32, i32) {
    %c0_i32 = arith.constant 0 : i32
    %c0_i32_0 = arith.constant 0 : i32
    %c0_i32_1 = arith.constant 0 : i32
    return %c0_i32, %c0_i32_0 : i32, i32
  }
  func.func @transform_3(%arg0: i32, %arg1: i32) -> (i32, i32) {
    %c0_i32 = arith.constant 0 : i32
    %c0_i32_0 = arith.constant 0 : i32
    %c0_i32_1 = arith.constant 0 : i32
    return %c0_i32, %c0_i32_0 : i32, i32
  }
  func.func @transform_4(%arg0: i32, %arg1: i32) -> (i32, i32) {
    %c0_i32 = arith.constant 0 : i32
    return %arg0, %arg1 : i32, i32
  }
}

</mosaic_0001>

<bundles_post_ra>
// kernel: tpu_custom_call.1
= control target key start
LH: loop header
LB: loop body
LE: loop exit
PB: predicated region body
PF: predicated region fallthrough
CT: control target
= control target key end

     0   :  { %9 = vsyncpa [#allocation3], 0  ;;  %s1140_s0 = inlined_call_operand.hbm [shape: bf16[8,128], index: 0, kind: input, shape index: {}]   ;;  %s1141_s1 = inlined_call_operand.hbm [shape: bf16[8,768], index: 1, kind: input, shape index: {}]   ;;  %s1142_s2 = inlined_call_operand.hbm [shape: bf16[128,128], index: 2, kind: input, shape index: {}]   ;;  %s1143_s3 = inlined_call_operand.hbm [shape: bf16[768,128], index: 3, kind: input, shape index: {}]   ;;  %s1144_s4 = inlined_call_operand.hbm [shape: f32[8,8], index: 4, kind: output, shape index: {}]  }
   0x1   :  { %10 = vsyncpa [#allocation6], 0 }
   0x2   :  { %11 = vsyncpa [#allocation9], 0  ;;  %s29_s17 = sshll.u32 %s1141_s1, 4  ;;  %s30_s17 = int_to_ptr.hbm [resolvable:$true] %s29_s17 }
   0x3   :  { %12 = vsyncpa [#allocation4], 0  ;;  %s1093_s18 = smov [#allocation5]   ;;  %s18_s22 = sshll.u32 %s1140_s0, 4  ;;  %s19_s22 = int_to_ptr.hbm [resolvable:$true] %s18_s22 }
   0x4   :  { %s31_s19 = sshll.u32 %s1093_s18, 4  ;;  %s1094_s23 = smov [#allocation2]   ;;  %s32_s19 = int_to_ptr.vmem [resolvable:$true] %s31_s19 }
   0x5   :  { %34 = dma.hbm_to_vmem [thread:$0]  %s30_s17, 384, %s32_s19, [#allocation6]  }
   0x6   :  { %s20_s24 = sshll.u32 %s1094_s23, 4  ;;  %s39_s27 = sshll.u32 %s1142_s2, 4  ;;  %s21_s24 = int_to_ptr.vmem [resolvable:$true] %s20_s24  ;;  %s40_s27 = int_to_ptr.hbm [resolvable:$true] %s39_s27 }
   0x7   :  { %23 = dma.hbm_to_vmem [thread:$0]  %s19_s22, 64, %s21_s24, [#allocation3]  }
   0x8   :  { %s1095_s1 = smov [#allocation7]   ;;  %s52_s5 = sshll.u32 %s1143_s3, 4  ;;  %s53_s5 = int_to_ptr.hbm [resolvable:$true] %s52_s5 }
   0x9   :  { %s41_s28 = sshll.u32 %s1095_s1, 4  ;;  %s1096_s6 = smov 64   ;;  %s42_s28 = int_to_ptr.vmem [resolvable:$true] %s41_s28 }
   0xa   :  { %s1097_s0 = smov 4   ;;  %s1098_s7 = smov [#allocation8]  }
   0xb   :  { %47 = dma.hbm_to_vmem [thread:$0]  %s40_s27, 1024, %s42_s28, [#allocation6], %s1096_s6, %s1096_s6, %s1097_s0  }
   0xc   :  { %s54_s8 = sshll.u32 %s1098_s7, 4  ;;  %s55_s8 = int_to_ptr.vmem [resolvable:$true] %s54_s8 }
   0xd   :  { %60 = dma.hbm_to_vmem [thread:$0]  %s53_s5, 6144, %s55_s8, [#allocation9], %s1096_s6, %s1096_s6, %s1097_s0  }
   0xe   :  { %1085 = dma.done.wait [#allocation3], 64  }
   0xf   :  { %1086 = vsyncadd [#allocation3], 4294967232 }
  0x10   :  { %1087 = dma.done.wait [#allocation6], 1408  }
  0x11   :  { %1088 = vsyncadd [#allocation6], 4294965888 }
  0x12   :  { %1089 = dma.done.wait [#allocation9], 6144  }
  0x13   :  { %1090 = vsyncadd [#allocation9], 4294961152  ;;  %v909_v0 = vld [vmem:[#allocation7 + $0x38] sm:$0xff]  ;;  %v908_v3 = vld [vmem:[#allocation7 + $0x30] sm:$0xff]  ;;  %s1099_s2 = smov [#allocation10]   ;;  %s666_s11 = sshll.u32 %s1144_s4, 4  ;;  %s667_s11 = int_to_ptr.hbm [resolvable:$true] %s666_s11 }
  0x14   :  { %v917_v1 = vld [vmem:[#allocation8 + $0x38] sm:$0xff]  ;;  %143 = vmatpush.bf16.msra.mxu0 %v909_v0  ;;  %v916_v4 = vld [vmem:[#allocation8 + $0x30] sm:$0xff]  ;;  %v907_v7 = vld [vmem:[#allocation7 + $0x28] sm:$0xff]  ;;  %s664_s3 = sshll.u32 %s1099_s2, 4  ;;  %vm657_vm0 = vcmask 64512   ;;  %s665_s3 = int_to_ptr.vmem [resolvable:$true] %s664_s3 }
  0x15   :  { %v925_v2 = vld [vmem:[#allocation8 + $0x78] sm:$0xff]  ;;  %564 = vmatpush.bf16.msra.mxu1 %v917_v1  ;;  %v924_v5 = vld [vmem:[#allocation8 + $0x70] sm:$0xff]  ;;  %v915_v8 = vld [vmem:[#allocation8 + $0x28] sm:$0xff] }
  0x16   :  { %577 = vmatpush.bf16.msra.mxu2 %v925_v2  ;;  %v933_v6 = vld [vmem:[#allocation8 + $0xb8] sm:$0xff]  ;;  %v923_v9 = vld [vmem:[#allocation8 + $0x68] sm:$0xff]  ;;  %v932_v10 = vld [vmem:[#allocation8 + $0xb0] sm:$0xff] }
  0x17   :  { %590 = vmatpush.bf16.msra.mxu3 %v933_v6  ;;  %v906_v11 = vld [vmem:[#allocation7 + $0x20] sm:$0xff]  ;;  %v931_v14 = vld [vmem:[#allocation8 + $0xa8] sm:$0xff]  ;;  %v905_v15 = vld [vmem:[#allocation7 + $0x18] sm:$0xff] }
  0x18   :  { %144 = vmatpush.bf16.msra.mxu0 %v908_v3  ;;  %v914_v12 = vld [vmem:[#allocation8 + $0x20] sm:$0xff]  ;;  %v913_v16 = vld [vmem:[#allocation8 + $0x18] sm:$0xff]  ;;  %v904_v19 = vld [vmem:[#allocation7 + $0x10] sm:$0xff] }
  0x19   :  { %565 = vmatpush.bf16.msra.mxu1 %v916_v4  ;;  %v922_v13 = vld [vmem:[#allocation8 + $0x60] sm:$0xff]  ;;  %v921_v17 = vld [vmem:[#allocation8 + $0x58] sm:$0xff]  ;;  %v912_v20 = vld [vmem:[#allocation8 + $0x10] sm:$0xff] }
  0x1a   :  { %578 = vmatpush.bf16.msra.mxu2 %v924_v5  ;;  %v930_v18 = vld [vmem:[#allocation8 + $0xa0] sm:$0xff]  ;;  %v920_v21 = vld [vmem:[#allocation8 + $0x50] sm:$0xff]  ;;  %v929_v22 = vld [vmem:[#allocation8 + $0x98] sm:$0xff] }
  0x1b   :  { %591 = vmatpush.bf16.msra.mxu3 %v932_v10  ;;  %v903_v23 = vld [vmem:[#allocation7 + $0x8] sm:$0xff]  ;;  %v928_v26 = vld [vmem:[#allocation8 + $0x90] sm:$0xff]  ;;  %v902_v28 = vld [vmem:[#allocation7] sm:$0xff] }
  0x1c   :  { %145 = vmatpush.bf16.msra.mxu0 %v907_v7  ;;  %v911_v24 = vld [vmem:[#allocation8 + $0x8] sm:$0xff]  ;;  %v910_v29 = vld [vmem:[#allocation8] sm:$0xff]  ;;  %v941_v33 = vld [vmem:[#allocation8 + $0xf8] sm:$0xff] }
  0x1d   :  { %566 = vmatpush.bf16.msra.mxu1 %v915_v8  ;;  %v919_v25 = vld [vmem:[#allocation8 + $0x48] sm:$0xff]  ;;  %v918_v32 = vld [vmem:[#allocation8 + $0x40] sm:$0xff]  ;;  %v949_v34 = vld [vmem:[#allocation8 + $0x138] sm:$0xff] }
  0x1e   :  { %579 = vmatpush.bf16.msra.mxu2 %v923_v9  ;;  %v156_v27 = vld [vmem:[#allocation5] sm:$0xff]  ;;  %v957_v35 = vld [vmem:[#allocation8 + $0x178] sm:$0xff]  ;;  %v78_v38 = vld [vmem:[#allocation2] sm:$0xf] }
  0x1f   :  { %592 = vmatpush.bf16.msra.mxu3 %v931_v14  ;;  %v259_v30 = vunpack.c.h.b16 %v156_v27  ;;  %v258_v31 = vunpack.c.l.b16 %v156_v27  ;;  %v927_v36 = vld [vmem:[#allocation8 + $0x88] sm:$0xff]  ;;  %v157_v40 = vld [vmem:[#allocation5 + $0x8] sm:$0xff]  ;;  %v926_v44 = vld [vmem:[#allocation8 + $0x80] sm:$0xff] }
  0x20   :  { %146 = vmatpush.bf16.msra.mxu0 %v906_v11  ;;  %v940_v41 = vld [vmem:[#allocation8 + $0xf0] sm:$0xff]  ;;  %v260_v45 = vunpack.c.l.b16 %v157_v40  ;;  %v939_v46 = vld [vmem:[#allocation8 + $0xe8] sm:$0xff]  ;;  %v938_v50 = vld [vmem:[#allocation8 + $0xe0] sm:$0xff]  ;;  %v261_v63 = vunpack.c.h.b16 %v157_v40 }
  0x21   :  { %567 = vmatpush.bf16.msra.mxu1 %v914_v12  ;;  %v265_v37 = vpack.c.b16 %v259_v30, %v259_v30  ;;  %v264_v39 = vpack.c.b16 %v258_v31, %v258_v31  ;;  %v948_v42 = vld [vmem:[#allocation8 + $0x130] sm:$0xff]  ;;  %v947_v47 = vld [vmem:[#allocation8 + $0x128] sm:$0xff]  ;;  %v946_v51 = vld [vmem:[#allocation8 + $0x120] sm:$0xff] }
  0x22   :  { %580 = vmatpush.bf16.msra.mxu2 %v922_v13  ;;  %v956_v43 = vld [vmem:[#allocation8 + $0x170] sm:$0xff]  ;;  %v955_v48 = vld [vmem:[#allocation8 + $0x168] sm:$0xff]  ;;  %v266_v49 = vpack.c.b16 %v260_v45, %v260_v45  ;;  %v954_v52 = vld [vmem:[#allocation8 + $0x160] sm:$0xff]  ;;  %v267_v5 = vpack.c.b16 %v261_v63, %v261_v63 }
  0x23   :  { %593 = vmatpush.bf16.msra.mxu3 %v930_v18  ;;  %v937_v53 = vld [vmem:[#allocation8 + $0xd8] sm:$0xff]  ;;  %v936_v56 = vld [vmem:[#allocation8 + $0xd0] sm:$0xff]  ;;  %v935_v59 = vld [vmem:[#allocation8 + $0xc8] sm:$0xff] }
  0x24   :  { %147 = vmatpush.bf16.msra.mxu0 %v905_v15  ;;  %v945_v54 = vld [vmem:[#allocation8 + $0x118] sm:$0xff]  ;;  %v944_v57 = vld [vmem:[#allocation8 + $0x110] sm:$0xff]  ;;  %v943_v60 = vld [vmem:[#allocation8 + $0x108] sm:$0xff] }
  0x25   :  { %568 = vmatpush.bf16.msra.mxu1 %v913_v16  ;;  %v953_v55 = vld [vmem:[#allocation8 + $0x158] sm:$0xff]  ;;  %v952_v58 = vld [vmem:[#allocation8 + $0x150] sm:$0xff]  ;;  %v951_v61 = vld [vmem:[#allocation8 + $0x148] sm:$0xff] }
  0x26   :  { %581 = vmatpush.bf16.msra.mxu2 %v921_v17  ;;  %v158_v62 = vld [vmem:[#allocation5 + $0x10] sm:$0xff]  ;;  %v934_v0 = vld [vmem:[#allocation8 + $0xc0] sm:$0xff] }
  0x27   :  { %594 = vmatpush.bf16.msra.mxu3 %v929_v22  ;;  %v262_v1 = vunpack.c.l.b16 %v158_v62  ;;  %v263_v2 = vunpack.c.h.b16 %v158_v62  ;;  %v942_v3 = vld [vmem:[#allocation8 + $0x100] sm:$0xff] }
  0x28   :  { %148 = vmatpush.bf16.msra.mxu0 %v904_v19  ;;  %v950_v4 = vld [vmem:[#allocation8 + $0x140] sm:$0xff] }
  0x29   :  { %569 = vmatpush.bf16.msra.mxu1 %v912_v20  ;;  %v268_v6 = vpack.c.b16 %v262_v1, %v262_v1  ;;  %v269_v7 = vpack.c.b16 %v263_v2, %v263_v2 }
  0x2a   :  { %582 = vmatpush.bf16.msra.mxu2 %v920_v21 }
  0x2b   :  { %595 = vmatpush.bf16.msra.mxu3 %v928_v26 }
  0x2c   :  { %149 = vmatpush.bf16.msra.mxu0 %v903_v23 }
  0x2d   :  { %570 = vmatpush.bf16.msra.mxu1 %v911_v24 }
  0x2e   :  { %583 = vmatpush.bf16.msra.mxu2 %v919_v25 }
  0x2f   :  { %596 = vmatpush.bf16.msra.mxu3 %v927_v36 }
  0x30   :  { %150 = vmatpush.bf16.msra.mxu0 %v902_v28 }
  0x31   :  { %571 = vmatpush.bf16.msra.mxu1 %v910_v29 }
  0x32   :  { %584 = vmatpush.bf16.msra.mxu2 %v918_v32 }
  0x33   :  { %151 = vmatmul.bf16.vlgmr.msra.gmra.mxu0 %v78_v38  ;;  %597 = vmatpush.bf16.msra.mxu3 %v926_v44 }
  0x34   :  { %603 = vmatpush.bf16.msrb.mxu0 %v941_v33  ;;  %572 = vmatmul.bf16.vlgmr.msra.gmra.mxu1 %v264_v39 }
  0x35   :  { %616 = vmatpush.bf16.msrb.mxu1 %v949_v34  ;;  %585 = vmatmul.bf16.vlgmr.msra.gmra.mxu2 %v265_v37 }
  0x36   :  { %629 = vmatpush.bf16.msrb.mxu2 %v957_v35  ;;  %598 = vmatmul.bf16.vlgmr.msra.gmra.mxu3 %v266_v49 }
  0x38   :  { %604 = vmatpush.bf16.msrb.mxu0 %v940_v41 }
  0x39   :  { %617 = vmatpush.bf16.msrb.mxu1 %v948_v42 }
  0x3a   :  { %630 = vmatpush.bf16.msrb.mxu2 %v956_v43 }
  0x3c   :  { %605 = vmatpush.bf16.msrb.mxu0 %v939_v46 }
  0x3d   :  { %618 = vmatpush.bf16.msrb.mxu1 %v947_v47 }
  0x3e   :  { %631 = vmatpush.bf16.msrb.mxu2 %v955_v48 }
  0x40   :  { %606 = vmatpush.bf16.msrb.mxu0 %v938_v50 }
  0x41   :  { %619 = vmatpush.bf16.msrb.mxu1 %v946_v51 }
  0x42   :  { %632 = vmatpush.bf16.msrb.mxu2 %v954_v52 }
  0x44   :  { %607 = vmatpush.bf16.msrb.mxu0 %v937_v53 }
  0x45   :  { %620 = vmatpush.bf16.msrb.mxu1 %v945_v54 }
  0x46   :  { %633 = vmatpush.bf16.msrb.mxu2 %v953_v55 }
  0x48   :  { %608 = vmatpush.bf16.msrb.mxu0 %v936_v56 }
  0x49   :  { %621 = vmatpush.bf16.msrb.mxu1 %v944_v57 }
  0x4a   :  { %634 = vmatpush.bf16.msrb.mxu2 %v952_v58 }
  0x4c   :  { %609 = vmatpush.bf16.msrb.mxu0 %v935_v59 }
  0x4d   :  { %622 = vmatpush.bf16.msrb.mxu1 %v943_v60 }
  0x4e   :  { %635 = vmatpush.bf16.msrb.mxu2 %v951_v61 }
  0x50   :  { %610 = vmatpush.bf16.msrb.mxu0 %v934_v0 }
  0x51   :  { %623 = vmatpush.bf16.msrb.mxu1 %v942_v3 }
  0x52   :  { %636 = vmatpush.bf16.msrb.mxu2 %v950_v4 }
  0x53   :  { %611 = vmatmul.bf16.vlgmr.msrb.gmra.mxu0 %v267_v5 }
  0x54   :  { %624 = vmatmul.bf16.vlgmr.msrb.gmra.mxu1 %v268_v6 }
  0x55   :  { %637 = vmatmul.bf16.vlgmr.msrb.gmra.mxu2 %v269_v7 }
  0xb0   :  { %v152_v8 = vpop.f32.mrf.mxu0 }
  0xb1   :  { %v573_v9 = vpop.f32.mrf.mxu1  ;;  %v642_v28 = vpack.c.bf16 %v152_v8, %v152_v8 }
  0xb8   :  { %v586_v10 = vpop.f32.mrf.mxu2  ;;  %v154_v11 = vpop.f32.mrf.mxu0 }
  0xb9   :  { %v575_v12 = vpop.f32.mrf.mxu1  ;;  %v599_v13 = vpop.f32.mrf.mxu3  ;;  %v587_v16 = vadd.f32 %v586_v10, %v573_v9 }
  0xbb   :  { %v600_v17 = vadd.f32 %v599_v13, %v587_v16 }
  0xc0   :  { %v588_v14 = vpop.f32.mrf.mxu2 }
  0xc1   :  { %v601_v15 = vpop.f32.mrf.mxu3 }
  0xd0   :  { %v612_v18 = vpop.f32.mrf.mxu0 }
  0xd1   :  { %v625_v19 = vpop.f32.mrf.mxu1  ;;  %v613_v20 = vadd.f32 %v612_v18, %v600_v17 }
  0xd3   :  { %v626_v21 = vadd.f32 %v625_v19, %v613_v20 }
  0xd8   :  { %v638_v22 = vpop.f32.mrf.mxu2  ;;  %v614_v24 = vpop.f32.mrf.mxu0 }
  0xd9   :  { %v639_v23 = vadd.f32 %v638_v22, %v626_v21  ;;  %v627_v25 = vpop.f32.mrf.mxu1 }
  0xdb   :  { %v643_v26 = vpack.c.bf16 %v639_v23, %v639_v23 }
  0xdd   :  { %651 = vmatpush.bf16.xpose.msrb.mxu3 %v643_v26 }
  0xe0   :  { %v640_v27 = vpop.f32.mrf.mxu2 }
  0xe4   :  { %652 = vmatmul.bf16.vlgmr.msrb.gmra.mxu3 %v642_v28 }
 0x167   :  { %v653_v29 = vpop.f32.mrf.mxu3 }
 0x168   :  { %658 = vst.msk [vmem:[#allocation10] sm:$0xff] %vm657_vm0, %v653_v29 }
 0x169   :  { %669 = dma.vmem_to_hbm [thread:$0]  %s665_s3, 128, %s667_s11, [#allocation4]  }
 0x16f   :  { %v655_v30 = vpop.f32.mrf.mxu3 }
 0x170   :  { %1091 = dma.done.wait [#allocation4], 128  }
 0x171   :  { %1092 = vsyncadd [#allocation4], 4294967168 }
 0x172   :  { %674 = vsyncpa [#allocation3], 1 }
 0x173   :  { %675 = vsyncpa [#allocation6], 1 }
 0x174   :  { %676 = vsyncpa [#allocation9], 1 }
 0x175   :  { %677 = vsyncpa [#allocation4], 1 }

</bundles_post_ra>
